<compile_context>
chip_gen: v6e
topology: v6e:2x2x1
jax: 0.10.0
libtpu: 0.0.40
codegen_flags: <defaults>
</compile_context>

<pallas_src>
import functools

import jax
import jax.numpy as jnp
from jax import lax
from jax.experimental import pallas as pl
from jax.experimental.pallas import tpu as pltpu


def _round_up(x, m):
    return ((x + m - 1) // m) * m


def _round_down(x, m):
    return (x // m) * m


def _cdiv(a, b):
    return -(-a // b)


def _default_target_block_bytes():
    """Generation-aware per-grid-step input DMA byte target (HBM-roofline sizing)."""
    try:
        kind = jax.devices()[0].device_kind.lower()
    except Exception:
        kind = ""
    if "v7" in kind:
        return 8 << 20   # ~3.2 TB/s HBM, 64 MiB VMEM: big steps, 2x8 MiB buffers fit
    if "v6" in kind:
        return 6 << 20   # ~1.4 TB/s HBM: 2x6 MiB fits the 32 MiB scoped-VMEM default
    return 3 << 20       # v5e (~0.82 TB/s) and unknown chips


def _l2norm_kernel_single(x_ref, o_ref):
    # x_ref: (BT, C, TS) -> o_ref: (BT, 1, TS). Whole channel dim in one block.
    x = x_ref[...]
    if x.dtype != jnp.float32:
        x = x.astype(jnp.float32)
    ss = jnp.sum(x * x, axis=1, keepdims=True)
    o_ref[...] = jnp.sqrt(ss).astype(o_ref.dtype)


def _l2norm_kernel_acc(x_ref, o_ref, acc_ref, *, c_total, c_tile, mask_channels):
    # Channel dim tiled over the last ("arbitrary") grid axis; f32 accumulator.
    c = pl.program_id(2)

    @pl.when(c == 0)
    def _():
        acc_ref[...] = jnp.zeros_like(acc_ref)

    x = x_ref[...]
    if x.dtype != jnp.float32:
        x = x.astype(jnp.float32)
    if mask_channels:
        # Mask the ragged last channel chunk (OOB block contents are garbage).
        ch = lax.broadcasted_iota(jnp.int32, x.shape, dimension=1)
        x = jnp.where(c * c_tile + ch < c_total, x, 0.0)
    acc_ref[...] += jnp.sum(x * x, axis=1, keepdims=True)

    @pl.when(c == pl.num_programs(2) - 1)
    def _():
        o_ref[...] = jnp.sqrt(acc_ref[...]).astype(o_ref.dtype)


def channel_l2_norm(x, target_block_bytes=None):
    """x: [B, C, H, W] -> [B, 1, H, W], L2 norm over dim=1 (channels)."""
    B, C, H, W = x.shape
    HW = H * W
    itemsize = x.dtype.itemsize
    target = (_default_target_block_bytes() if target_block_bytes is None
              else int(target_block_bytes))

    xf = x.reshape(B, C, HW)          # metadata-only reshape; no pad, no extra HBM pass
    row_bytes = C * HW * itemsize

    if row_bytes <= target:
        # Case A: one block holds the whole (C, HW) slab; tile over the batch dim.
        BT, CT, TS = min(B, max(1, target // max(1, row_bytes))), C, HW
        if B >= 2 and _cdiv(B, BT) < 2:
            BT = _cdiv(B, 2)          # keep >= 2 parallel tiles (v7x dual TensorCore)
        nb, ns = _cdiv(B, BT), 1
        if nb * ns < 2 and HW >= 256:  # B == 1: split spatially so both cores get work
            TS = min(HW, _round_up(_cdiv(HW, 2), 128))
            ns = _cdiv(HW, TS)
    elif C * 128 * itemsize <= target:
        # Case B: full channel dim; tile the flattened spatial (lane) axis.
        BT, CT = 1, C
        TS = max(128, min(_round_down(target // (C * itemsize), 128),
                          _round_down(HW, 128)))
        nb, ns = B, _cdiv(HW, TS)
    else:
        # Case C: very large C — tile channels too (reduction axis, last in grid).
        BT = 1
        if HW >= 512:
            TS = 512
        elif HW >= 128:
            TS = _round_down(HW, 128)
        else:
            TS = HW
        CT = min(C, max(32, _round_down(target // (TS * itemsize), 32)))
        nb, ns = B, _cdiv(HW, TS)

    nc = _cdiv(C, CT)

    in_block = (BT, CT, TS)
    out_block = (BT, 1, TS)

    # VMEM budget: double-buffered input + output blocks (+ accumulator), headroom.
    in_bytes = BT * CT * TS * itemsize
    out_bytes = BT * TS * itemsize
    acc_bytes = BT * TS * 4 if nc > 1 else 0
    vmem_limit = int(min(2 * in_bytes + 2 * out_bytes + acc_bytes + (8 << 20), 48 << 20))

    cost = pl.CostEstimate(
        flops=2 * B * C * HW,
        transcendentals=B * HW,
        bytes_accessed=(B * C * HW + B * HW) * itemsize,
    )

    if nc == 1:
        # Fast path: single reduction step, no scratch accumulator.
        grid = (nb, ns)
        kernel = _l2norm_kernel_single
        in_specs = [pl.BlockSpec(in_block, lambda b, s: (b, 0, s))]
        out_specs = pl.BlockSpec(out_block, lambda b, s: (b, 0, s))
        scratch_shapes = ()
        dim_sem = ("parallel", "parallel")
    else:
        grid = (nb, ns, nc)
        kernel = functools.partial(
            _l2norm_kernel_acc, c_total=C, c_tile=CT,
            mask_channels=(C % CT != 0))
        in_specs = [pl.BlockSpec(in_block, lambda b, s, c: (b, c, s))]
        out_specs = pl.BlockSpec(out_block, lambda b, s, c: (b, 0, s))
        scratch_shapes = [pltpu.VMEM(out_block, jnp.float32)]
        dim_sem = ("parallel", "parallel", "arbitrary")

    out = pl.pallas_call(
        kernel,
        out_shape=jax.ShapeDtypeStruct((B, 1, HW), x.dtype),
        grid=grid,
        in_specs=in_specs,
        out_specs=out_specs,
        scratch_shapes=scratch_shapes,
        compiler_params=pltpu.CompilerParams(
            dimension_semantics=dim_sem,
            vmem_limit_bytes=vmem_limit,
        ),
        cost_estimate=cost,
    )(xf)

    return out.reshape(B, 1, H, W)


if __name__ == "__main__":
    key = jax.random.PRNGKey(0)

    # Shape implied by the module's forward (NCHW, norm over channels).
    x = jax.random.normal(key, (2, 4, 16, 16), dtype=jnp.float32)
    out = jax.block_until_ready(channel_l2_norm(x))
    ref = jnp.linalg.norm(x, axis=1, keepdims=True)
    assert out.shape == (2, 1, 16, 16)
    assert jnp.allclose(out, ref, atol=1e-5, rtol=1e-5)

    # Exercise the spatially tiled path and the channel-tiled masked-accumulator
    # path with tiny artificial byte budgets (correctness of all code paths).
    k1, k2 = jax.random.split(key)
    xb = jax.random.normal(k1, (1, 8, 8, 64), dtype=jnp.float32)
    outb = jax.block_until_ready(channel_l2_norm(xb, target_block_bytes=8192))
    assert jnp.allclose(outb, jnp.linalg.norm(xb, axis=1, keepdims=True),
                        atol=1e-5, rtol=1e-5)

    xc = jax.random.normal(k2, (1, 40, 4, 64), dtype=jnp.float32)
    outc = jax.block_until_ready(channel_l2_norm(xc, target_block_bytes=2048))
    assert jnp.allclose(outc, jnp.linalg.norm(xc, axis=1, keepdims=True),
                        atol=1e-5, rtol=1e-5)

    print("KERNEL_OK")
</pallas_src>

<mosaic_0001>
module attributes {stable_mosaic.version = 11 : i64} {
  func.func @_l2norm_kernel_single(%arg0: i32, %arg1: i32, %arg2: memref<1x4x256xf32, #tpu.memory_space<vmem>>, %arg3: memref<1x1x256xf32, #tpu.memory_space<vmem>>) attributes {dimension_semantics = [#tpu.dimension_semantics<parallel>, #tpu.dimension_semantics<parallel>], iteration_bounds = array<i64: 2, 1>, scalar_prefetch = 0 : i64, scratch_operands = 0 : i64, tpu.core_type = #tpu.core_type<tc>, window_params = [{transform_indices = @transform_0, window_bounds = array<i64: 1, 4, 256>}, {transform_indices = @transform_1, window_bounds = array<i64: 1, 1, 256>}]} {
    %c0 = arith.constant 0 : index
    %c0_0 = arith.constant 0 : index
    %c0_1 = arith.constant 0 : index
    %0 = vector.load %arg2[%c0, %c0_0, %c0_1] : memref<1x4x256xf32, #tpu.memory_space<vmem>>, vector<1x4x256xf32>
    %1 = arith.mulf %0, %0 : vector<1x4x256xf32>
    %cst = arith.constant dense<0.000000e+00> : vector<1x256xf32>
    %2 = vector.multi_reduction <add>, %1, %cst [1] : vector<1x4x256xf32> to vector<1x256xf32>
    %3 = vector.shape_cast %2 : vector<1x256xf32> to vector<1x1x256xf32>
    %4 = math.sqrt %3 : vector<1x1x256xf32>
    %c0_2 = arith.constant 0 : index
    %c0_3 = arith.constant 0 : index
    %c0_4 = arith.constant 0 : index
    %5 = vector.load %arg3[%c0_2, %c0_3, %c0_4] : memref<1x1x256xf32, #tpu.memory_space<vmem>>, vector<1x1x256xf32>
    tpu.vector_store %arg3[%c0_2, %c0_3, %c0_4], %4 {strides = array<i32>} : memref<1x1x256xf32, #tpu.memory_space<vmem>>, vector<1x1x256xf32>,
    return
  }
  func.func @transform_0(%arg0: i32, %arg1: i32) -> (i32, i32, i32) {
    %c0_i32 = arith.constant 0 : i32
    %c0_i32_0 = arith.constant 0 : i32
    return %arg0, %c0_i32, %arg1 : i32, i32, i32
  }
  func.func @transform_1(%arg0: i32, %arg1: i32) -> (i32, i32, i32) {
    %c0_i32 = arith.constant 0 : i32
    %c0_i32_0 = arith.constant 0 : i32
    return %arg0, %c0_i32, %arg1 : i32, i32, i32
  }
}

</mosaic_0001>

<bundles_post_ra>
// kernel: tpu_custom_call.1
= control target key start
LH: loop header
LB: loop body
LE: loop exit
PB: predicated region body
PF: predicated region fallthrough
CT: control target
= control target key end

     0   :  { %6 = vsyncpa [#allocation3], 0  ;;  %s653_s0 = inlined_call_operand.hbm [shape: f32[2,4,256], index: 0, kind: input, shape index: {}]   ;;  %s654_s1 = inlined_call_operand.hbm [shape: f32[2,1,256], index: 1, kind: output, shape index: {}]  }
   0x1   :  { %8 = vsyncpa [#allocation3 + $0x1], 0 }
   0x2   :  { %9 = vsyncpa [#allocation4], 0 }
   0x3   :  { %11 = vsyncpa [#allocation4 + $0x1], 0  ;;  %s518_s6 = smov 0   ;;  %s520_s7 = smov 0  }
   0x4   :  { %s522_s8 = smov 0   ;;  %s524_s9 = smov 0  }
   0x5   :  { %s526_s10 = smov 0   ;;  %s528_s11 = smov 0  }
   0x6 LB: > { %s311_s12 = sadd.s32 4294967295, %s503_s11   ;;  %s312_s13 = sadd.s32 4294967294, %s503_s11   ;;  %s503_s11 = sphi %s528_s11, %s17_s11   ;;  %s499_s10 = sphi %s526_s10, %s666_s10   ;;  %s495_s9 = sphi %s524_s9, %s665_s9   ;;  %s491_s8 = sphi %s522_s8, %s664_s8   ;;  %s487_s7 = sphi %s520_s7, %s663_s7   ;;  %s483_s6 = sphi %s518_s6, %s662_s6  }
   0x7   : > { %s29_s14 = sadd.s32 1, %s499_s10  ;;  %s38_s15 = sadd.s32 1, %s491_s8 }
   0x8   : > { %p31_p0 = scmp.ge.s32.totalorder %s29_s14, 2  ;;  %p45_p1 = scmp.ne.s32.totalorder %s491_s8, %s487_s7 }
   0x9   : > { %p46_p2 = scmp.eq.s32.totalorder %s503_s11, 0  ;;  %p51_p3 = scmp.ne.s32.totalorder %s487_s7, %s483_s6 }
   0xa   : > { %s668_s14 = smov (%p31_p0, %s29_s14), 0  ;;  %p52_p5 = scmp.eq.s32.totalorder %s311_s12, 0 }
   0xb   : > { %p559_p4 = por %p46_p2, %p45_p1  ;;  %s33_s17 = ssub.s32 %s499_s10, %s668_s14 }
   0xc   : > { %p77_p6 = scmp.eq.s32.totalorder %s311_s12, 1  ;;  %p36_p7 = scmp.eq.s32.totalorder %s33_s17, 0 }
   0xd   : > { %p565_p8 = por %p52_p5, %p51_p3  ;;  %p83_p10 = scmp.eq.s32.totalorder %s312_s13, 1 }
   0xe   : > { %p569_p9 = por %p77_p6, %p45_p1  ;;  %p340_p13 = scmp.lt.s32.totalorder %s503_s11, 2 }
   0xf   : > { %s574_s20 = scalar_select %p36_p7, %s491_s8, %s38_s15  }
  0x10   : > { %p576_p11 = por %p83_p10, %p51_p3  ;;  %s103_s22 = sand.u32 1, %s491_s8  }
  0x11   : > { %s315_s23 = sshll.u32 %s103_s22, 3  ;;  %s326_s24 = sshll.u32 %s499_s10, 7 }
  0x12   : > { %s658_s21 = scalar_select %p576_p11, 1, 0 }
  0x13   : > { %s115_s27 = scalar_lea.hbm %s653_s0, %s326_s24  ;;  %s107_s28 = scalar_lea.vmem [#allocation2], %s315_s23 }
  0x14   : > { %s117_s29 = sshll.u32 %s107_s28, 4  ;;  %p589_p0 = pnand %p340_p13, %p559_p4  ;;  %s118_s29 = int_to_ptr.vmem [resolvable:$true] %s117_s29 }
  0x15   : > { %p318_p1 = scmp.ge.s32.totalorder %s503_s11, 1  ;;  %p122_p2 = scmp.lt.s32.totalorder %s503_s11, 3 }
  0x16   : > { %s104_s2 = scalar_lea.sflag [#allocation3], %s103_s22  ;;  %p397_p3 = pneg %p589_p0 }
  0x17   : > { %s408_s3 = scalar_lea.vmem %s118_s29, 128  ;;  %s505_s4 = smov [#allocation2]  }
  0x18   : > { %p409_p5 = scmp.ne.s32.totalorder %s118_s29, %s408_s3  ;;  %s413_s5 = sshll.u32 %s505_s4, 4  ;;  %s414_s5 = int_to_ptr.vmem [resolvable:$false] %s413_s5 }
  0x19   : > { %s415_s12 = scalar_lea.vmem %s414_s5, 256  ;;  %p416_p10 = scmp.lt.s32.totalorder %s118_s29, %s414_s5 }
  0x1a   : > { %p411_p6 = pnand %p409_p5, %p397_p3  ;;  %p417_p12 = scmp.lt.s32.totalorder %s415_s12, %s408_s3 }
  0x1c   : > { %p412_p7 = pneg %p411_p6  ;;  %p418_p4 = por %p417_p12, %p416_p10 }
  0x1e   : > { %p419_p13 = pnand %p418_p4, %p412_p7 }
  0x20   : > { %422 = shalt.err (!%p419_p13)
}
  0x21   : > { %335 = dma.hbm_to_vmem [thread:$0]  (!%p589_p0), %s115_s27, 128, %s118_s29, %s104_s2  }
  0x22   : > { %p123_p11 = pnand %p318_p1, %p122_p2 }
  0x23   : > { %s604_s13 = sand.u32 (!%p123_p11), 1, %s487_s7  }
  0x24   : > { %126 = sbr.rel (%p123_p11) target bundleno = 97 (0x61), region = 24  ;;  %s319_s15 = sshll.u32 (!%p123_p11), %s604_s13, 3 }
  0x25   : > { %s129_s16 = scalar_lea.sflag (!%p123_p11), [#allocation3], %s604_s13  ;;  %s132_s17 = scalar_lea.vmem (!%p123_p11), [#allocation2], %s319_s15 }
  0x29   : > { %474 = dma.done.wait (%p565_p8), %s129_s16, 128  }
  0x2a   : > { %476 = vsyncadd (%p565_p8), %s129_s16, 4294967168  ;;  %v153_v0 = vld [vmem:[%s132_s17] sm:$0xff]  ;;  %vm158_vm0 = vcmask 1043456   ;;  %v506_v17 = vmov 1966171168   ;;  %v193_v19 = vlaneseq  ;;  %s320_s18 = sshll.u32 %s604_s13, 1 }
  0x2b   : > { %v154_v1 = vmul.f32 %v153_v0, %v153_v0  ;;  %v191_v18 = vunpack.c.l.s4 %v506_v17  ;;  %s150_s22 = scalar_lea.vmem [#allocation5], %s320_s18  ;;  %s327_s24 = sshll.u32 %s495_s9, 5 }
  0x2c   : > { %v194_v24 = vshrl.u32 %v193_v19, 7  ;;  %s227_s23 = sshll.u32 %s150_s22, 4  ;;  %vm207_vm5 = vcmp.lt.s32.totalorder %v193_v19, 256  ;;  %s225_s27 = scalar_lea.hbm %s654_s1, %s327_s24  ;;  %s228_s23 = int_to_ptr.vmem [resolvable:$true] %s227_s23 }
  0x2d   : > { %v156_v2 = vcombine.high %v154_v1, %v154_v1  ;;  %v159_v3 = vsel %vm158_vm0, %v154_v1, 0.0  ;;  %v192_v23 = vunpack.c.0.s8 %v191_v18  ;;  %s211_s28 = scalar_lea.sflag [#allocation4], %s604_s13  ;;  %s423_s29 = scalar_lea.vmem %s228_s23, 32 }
  0x2e   : > { %v160_v4 = vrot.slane %v159_v3, 4  ;;  %p424_p8 = scmp.ne.s32.totalorder %s228_s23, %s423_s29  ;;  %s507_s30 = smov [#allocation5]  }
  0x2f   : > { %v166_v5 = vsel %vm158_vm0, %v156_v2, 0.0  ;;  %v195_v31 = vsub.s32 %v192_v23, %v194_v24  ;;  %s427_s2 = sshll.u32 %s507_s30, 4  ;;  %s428_s2 = int_to_ptr.vmem [resolvable:$false] %s427_s2 }
  0x30   : > { %v161_v6 = vadd.f32 %v160_v4, %v159_v3  ;;  %v167_v7 = vrot.slane %v166_v5, 4  ;;  %p425_p11 = pnand %p424_p8, %p569_p9  ;;  %s429_s3 = scalar_lea.vmem %s428_s2, 64 }
  0x31   : > { %p430_p0 = scmp.lt.s32.totalorder %s228_s23, %s428_s2  ;;  %p431_p1 = scmp.lt.s32.totalorder %s429_s3, %s423_s29 }
  0x32   : > { %v162_v8 = vrot.slane %v161_v6, 2  ;;  %v168_v9 = vadd.f32 %v167_v7, %v166_v5  ;;  %p426_p12 = pneg %p425_p11 }
  0x33   : > { %p432_p2 = por %p431_p1, %p430_p0 }
  0x34   : > { %v163_v10 = vadd.f32 %v162_v8, %v161_v6  ;;  %v169_v11 = vrot.slane %v168_v9, 2 }
  0x35   : > { %p433_p3 = pnand %p432_p2, %p426_p12 }
  0x36   : > { %v164_v12 = vrot.slane %v163_v10, 1  ;;  %v170_v13 = vadd.f32 %v169_v11, %v168_v9 }
  0x38   : > { %v165_v14 = vadd.f32 %v164_v12, %v163_v10  ;;  %v171_v15 = vrot.slane %v170_v13, 1 }
  0x3a   : > { %v172_v16 = vadd.f32 %v171_v15, %v170_v13  ;;  %391 = vrsqrt.f32 %v165_v14  ;;  %vm175_vm1 = vcmp.eq.f32.partialorder %v165_v14, inf  ;;  %v178_v21 = vand.u32 2147483648, %v165_v14 }
  0x3b   : > { %vm177_vm2 = vcmp.eq.f32.partialorder %v165_v14, 0.0 }
  0x3c   : > { %393 = vrsqrt.f32 %v172_v16  ;;  %vm182_vm3 = vcmp.eq.f32.partialorder %v172_v16, inf  ;;  %v185_v26 = vand.u32 2147483648, %v172_v16  ;;  %vm184_vm4 = vcmp.eq.f32.partialorder %v172_v16, 0.0 }
  0x47   : > { %v392_v20 = vpop.eup %391 }
  0x48   : > { %v174_v22 = vmul.f32 %v392_v20, %v165_v14 }
  0x49   : > { %v394_v25 = vpop.eup %393 }
  0x4a   : > { %v176_v27 = vsel %vm175_vm1, %v165_v14, %v174_v22  ;;  %v181_v28 = vmul.f32 %v394_v25, %v172_v16 }
  0x4b   : > { %v179_v29 = vsel %vm177_vm2, %v178_v21, %v176_v27 }
  0x4c   : > { %v183_v30 = vsel %vm182_vm3, %v172_v16, %v181_v28 }
  0x4d   : > { %v186_v32 = vsel %vm184_vm4, %v185_v26, %v183_v30 }
  0x4e   : > { %v189_v33 = vcombine.low %v179_v29, %v186_v32 }
  0x50   : > { %v196_v34 = vrot.slane %v189_v33, %v195_v31 }
  0x52   : > { %v203_v35 = vrot.slane %v196_v34, %v195_v31 }
  0x54   : > { %209 = vst.msk [vmem:[%s150_s22] sm:$0x3] %vm207_vm5, %v203_v35 }
  0x55   : > { %436 = shalt.err (!%p433_p3)
}
  0x56   : > { %s437_s9 = scalar_lea.hbm %s225_s27, 32  ;;  %s441_s12 = scalar_lea.hbm %s654_s1, 64 }
  0x57   : > { %p438_p5 = scmp.ne.s32.totalorder %s225_s27, %s437_s9  ;;  %p442_p10 = scmp.lt.s32.totalorder %s225_s27, %s654_s1 }
  0x58   : > { %p443_p4 = scmp.lt.s32.totalorder %s441_s12, %s437_s9 }
  0x59   : > { %p439_p6 = pnand %p438_p5, %p569_p9 }
  0x5a   : > { %p444_p13 = por %p443_p4, %p442_p10 }
  0x5b   : > { %p440_p7 = pneg %p439_p6 }
  0x5d   : > { %p445_p8 = pnand %p444_p13, %p440_p7 }
  0x5f   : > { %448 = shalt.err (!%p445_p8)
}
  0x60   : > { %330 = dma.vmem_to_hbm [thread:$0]  (%p569_p9), %s228_s23, 32, %s225_s27, %s211_s28  }
  0x61 PF: > { %s239_s16 = sand.u32 1, %s483_s6   ;;  %p660_p11 = scmp.ne.s32.totalorder %s658_s21, 0 }
  0x62   : > { %p661_p12 = scmp.ge.s32.totalorder %s503_s11, 2  ;;  %s240_s17 = scalar_lea.sflag [#allocation4], %s239_s16 }
  0x64   : > { %p337_p0 = pnand %p661_p12, %p660_p11 }
  0x66   : > { %p338_p1 = pneg %p337_p0 }
  0x68   : > { %478 = dma.done.wait (%p338_p1), %s240_s17, 32  }
  0x69   : > { %480 = vsyncadd (%p338_p1), %s240_s17, 4294967264  ;;  %s17_s11 = sadd.s32 1, %s503_s11   ;;  %s662_s6 = smov %s487_s7 }
  0x6a   : > { %p14_p2 = scmp.ge.s32.totalorder %s17_s11, 4   ;;  %s663_s7 = smov %s491_s8 }
  0x6b   : > { %s664_s8 = smov %s574_s20  ;;  %s665_s9 = smov %s499_s10 }
  0x6c   : > { %s666_s10 = smov %s668_s14  ;;  %16 = sbr.rel (!%p14_p2) target bundleno = 6 (0x6), region = 69 }
  0x71   :  { %245 = vsyncpa [#allocation3], 1 }
  0x72   :  { %247 = vsyncpa [#allocation3 + $0x1], 1 }
  0x73   :  { %248 = vsyncpa [#allocation4], 1 }
  0x74   :  { %250 = vsyncpa [#allocation4 + $0x1], 1 }

</bundles_post_ra>
